<compile_context>
chip_gen: v6e
topology: v6e:2x2x1
jax: 0.10.0
libtpu: 0.0.40
codegen_flags: <defaults>
</compile_context>

<pallas_src>
import jax
import jax.numpy as jnp
from jax.experimental import pallas as pl
from jax.experimental.pallas import tpu as pltpu

# Small deterministic problem sizes (consistent with a 4-channel image input).
B, CIN, H, W = 2, 4, 16, 16
COUT = 32
KH = KW = 3
NUM_CLASSES = 8
NUM_DOMAINS = 2  # domain_head output size; unused in forward()

KK = KH * KW * CIN  # 36: im2col contraction length


def dann_forward_kernel(patches_ref, wconv_ref, bconv_ref, pool_ref,
                        wcls_ref, bcls_ref, out_ref):
    """Fused backbone + cls_head forward.

    patches_ref: [B*H*W, KK]        bf16   (im2col'd, lane-dense)
    wconv_ref  : [KK, COUT]         bf16   (pre-flattened conv weights)
    bconv_ref  : [1, COUT]          f32
    pool_ref   : [B, B*H*W]         f32    (block-diagonal 1/(H*W) pooling matrix)
    wcls_ref   : [COUT, NUM_CLASSES] f32
    bcls_ref   : [1, NUM_CLASSES]   f32
    out_ref    : [B, NUM_CLASSES]   f32
    """
    # --- Conv2d(3x3, pad=1) as ONE im2col matmul on the MXU ----------------
    acc = jnp.dot(patches_ref[...], wconv_ref[...],
                  preferred_element_type=jnp.float32)        # [B*H*W, COUT] f32
    acc = jnp.maximum(acc + bconv_ref[...], 0.0)              # bias + ReLU

    # --- Global average pool as a pooling matmul ---------------------------
    feats = jnp.dot(pool_ref[...], acc,
                    preferred_element_type=jnp.float32)       # [B, COUT]

    # --- cls_head: Linear(COUT -> NUM_CLASSES) ------------------------------
    logits = jnp.dot(feats, wcls_ref[...],
                     preferred_element_type=jnp.float32)      # [B, NUM_CLASSES]
    out_ref[...] = logits + bcls_ref[...]


def _im2col(x_nchw):
    """NCHW -> zero-padded NHWC -> [B*H*W, KH*KW*CIN] patch matrix (f32)."""
    x = jnp.transpose(x_nchw, (0, 2, 3, 1))                   # NCHW -> NHWC
    x_pad = jnp.pad(x, ((0, 0), (1, 1), (1, 1), (0, 0)))      # 'same' padding
    cols = []
    for kh in range(KH):                                      # kh-major, kw, cin:
        for kw in range(KW):                                  # matches wconv.reshape
            cols.append(x_pad[:, kh:kh + H, kw:kw + W, :])    # [B, H, W, CIN]
    patches = jnp.concatenate(cols, axis=-1)                  # [B, H, W, KK]
    return patches.reshape(B * H * W, KK)


def dann_forward(x_nchw, wconv, bconv, wcls, bcls):
    """PyTorch-semantics wrapper: x_nchw is [B, CIN, H, W] float32."""
    # Layout / im2col prep done once in the wrapper (XLA), kernel is pure MXU work.
    patches = _im2col(x_nchw).astype(jnp.bfloat16)            # [B*H*W, KK] bf16
    wconv_flat = wconv.reshape(KK, COUT).astype(jnp.bfloat16) # [KK, COUT]  bf16
    pool = jnp.repeat(jnp.eye(B, dtype=jnp.float32), H * W, axis=1) / float(H * W)

    flops = (2 * (B * H * W) * KK * COUT          # conv matmul
             + 2 * B * (B * H * W) * COUT         # pooling matmul
             + 2 * B * COUT * NUM_CLASSES)        # cls head
    bytes_accessed = (patches.size * 2 + wconv_flat.size * 2
                      + (COUT + pool.size + wcls.size + NUM_CLASSES
                         + B * NUM_CLASSES) * 4)
    cost = pl.CostEstimate(flops=flops, transcendentals=0,
                           bytes_accessed=bytes_accessed)

    vmem = pl.BlockSpec(memory_space=pltpu.MemorySpace.VMEM)
    return pl.pallas_call(
        dann_forward_kernel,
        out_shape=jax.ShapeDtypeStruct((B, NUM_CLASSES), jnp.float32),
        in_specs=[vmem, vmem, vmem, vmem, vmem, vmem],
        out_specs=vmem,
        cost_estimate=cost,
    )(patches, wconv_flat, bconv.reshape(1, COUT), pool,
      wcls, bcls.reshape(1, NUM_CLASSES))


def dann_forward_ref(x_nchw, wconv, bconv, wcls, bcls):
    """Pure-JAX reference (same im2col + bf16 matmul operands)."""
    patches = _im2col(x_nchw).astype(jnp.bfloat16)
    wconv_flat = wconv.reshape(KK, COUT).astype(jnp.bfloat16)
    acc = jnp.dot(patches, wconv_flat, preferred_element_type=jnp.float32)
    acc = jnp.maximum(acc + bconv[None, :], 0.0)
    feats = jnp.mean(acc.reshape(B, H * W, COUT), axis=1)      # [B, COUT]
    return feats @ wcls + bcls


if __name__ == "__main__":
    key = jax.random.PRNGKey(0)
    k_x, k_wc, k_bc, k_wcls, k_bcls, k_wdom, k_bdom = jax.random.split(key, 7)

    # Deterministic synthetic input + parameters (no checkpoint loading).
    x = jax.random.normal(k_x, (B, CIN, H, W), dtype=jnp.float32)
    wconv = 0.1 * jax.random.normal(k_wc, (KH, KW, CIN, COUT), dtype=jnp.float32)
    bconv = 0.1 * jax.random.normal(k_bc, (COUT,), dtype=jnp.float32)
    wcls = 0.1 * jax.random.normal(k_wcls, (COUT, NUM_CLASSES), dtype=jnp.float32)
    bcls = 0.1 * jax.random.normal(k_bcls, (NUM_CLASSES,), dtype=jnp.float32)
    # domain_head parameters (defined for completeness; forward() never uses them)
    wdom = 0.1 * jax.random.normal(k_wdom, (COUT, NUM_DOMAINS), dtype=jnp.float32)
    bdom = 0.1 * jax.random.normal(k_bdom, (NUM_DOMAINS,), dtype=jnp.float32)

    out = dann_forward(x, wconv, bconv, wcls, bcls)
    out = jax.block_until_ready(out)

    ref = dann_forward_ref(x, wconv, bconv, wcls, bcls)
    assert out.shape == (B, NUM_CLASSES)
    assert jnp.allclose(out, ref, rtol=1e-3, atol=1e-3), (out, ref)

    print("KERNEL_OK")
</pallas_src>

<mosaic_0001>
module attributes {stable_mosaic.version = 11 : i64} {
  func.func @dann_forward_kernel(%arg0: memref<512x36xbf16, #tpu.memory_space<vmem>>, %arg1: memref<36x32xbf16, #tpu.memory_space<vmem>>, %arg2: memref<1x32xf32, #tpu.memory_space<vmem>>, %arg3: memref<2x512xf32, #tpu.memory_space<vmem>>, %arg4: memref<32x8xf32, #tpu.memory_space<vmem>>, %arg5: memref<1x8xf32, #tpu.memory_space<vmem>>, %arg6: memref<2x8xf32, #tpu.memory_space<vmem>>) attributes {dimension_semantics = [], scalar_prefetch = 0 : i64, scratch_operands = 0 : i64, tpu.core_type = #tpu.core_type<tc>} {
    %c0 = arith.constant 0 : index
    %c0_0 = arith.constant 0 : index
    %0 = vector.load %arg0[%c0, %c0_0] : memref<512x36xbf16, #tpu.memory_space<vmem>>, vector<512x36xbf16>
    %c0_1 = arith.constant 0 : index
    %c0_2 = arith.constant 0 : index
    %1 = vector.load %arg1[%c0_1, %c0_2] : memref<36x32xbf16, #tpu.memory_space<vmem>>, vector<36x32xbf16>
    %cst = arith.constant dense<0.000000e+00> : vector<512x32xf32>
    %2 = tpu.matmul %0, %1, %cst {dimension_numbers = #tpu.dot_dimension_numbers<[1], [0], [0], [1], [0, 0, 1, 1], [], []>} : vector<512x36xbf16>, vector<36x32xbf16>, vector<512x32xf32> -> vector<512x32xf32>
    %c0_3 = arith.constant 0 : index
    %c0_4 = arith.constant 0 : index
    %3 = vector.load %arg2[%c0_3, %c0_4] : memref<1x32xf32, #tpu.memory_space<vmem>>, vector<1x32xf32>
    %4 = vector.broadcast %3 : vector<1x32xf32> to vector<512x32xf32>
    %5 = arith.addf %2, %4 : vector<512x32xf32>
    %cst_5 = arith.constant 0.000000e+00 : f32
    %6 = vector.broadcast %cst_5 : f32 to vector<512x32xf32>
    %7 = arith.maximumf %5, %6 : vector<512x32xf32>
    %c0_6 = arith.constant 0 : index
    %c0_7 = arith.constant 0 : index
    %8 = vector.load %arg3[%c0_6, %c0_7] : memref<2x512xf32, #tpu.memory_space<vmem>>, vector<2x512xf32>
    %cst_8 = arith.constant dense<0.000000e+00> : vector<2x32xf32>
    %9 = tpu.matmul %8, %7, %cst_8 {dimension_numbers = #tpu.dot_dimension_numbers<[1], [0], [0], [1], [0, 0, 1, 1], [], []>} : vector<2x512xf32>, vector<512x32xf32>, vector<2x32xf32> -> vector<2x32xf32>
    %c0_9 = arith.constant 0 : index
    %c0_10 = arith.constant 0 : index
    %10 = vector.load %arg4[%c0_9, %c0_10] : memref<32x8xf32, #tpu.memory_space<vmem>>, vector<32x8xf32>
    %cst_11 = arith.constant dense<0.000000e+00> : vector<2x8xf32>
    %11 = tpu.matmul %9, %10, %cst_11 {dimension_numbers = #tpu.dot_dimension_numbers<[1], [0], [0], [1], [0, 0, 1, 1], [], []>} : vector<2x32xf32>, vector<32x8xf32>, vector<2x8xf32> -> vector<2x8xf32>
    %c0_12 = arith.constant 0 : index
    %c0_13 = arith.constant 0 : index
    %12 = vector.load %arg5[%c0_12, %c0_13] : memref<1x8xf32, #tpu.memory_space<vmem>>, vector<1x8xf32>
    %13 = vector.broadcast %12 : vector<1x8xf32> to vector<2x8xf32>
    %14 = arith.addf %11, %13 : vector<2x8xf32>
    %c0_14 = arith.constant 0 : index
    %c0_15 = arith.constant 0 : index
    %15 = vector.load %arg6[%c0_14, %c0_15] : memref<2x8xf32, #tpu.memory_space<vmem>>, vector<2x8xf32>
    tpu.vector_store %arg6[%c0_14, %c0_15], %14 {strides = array<i32>} : memref<2x8xf32, #tpu.memory_space<vmem>>, vector<2x8xf32>,
    return
  }
}

</mosaic_0001>

<bundles_post_ra>
// kernel: tpu_custom_call.1
= control target key start
LH: loop header
LB: loop body
LE: loop exit
PB: predicated region body
PF: predicated region fallthrough
CT: control target
= control target key end

     0   :  { %vm373_vm0 = vcmask 1041408   ;;  %vm276_vm1 = vcmask 293888   ;;  %s1727_s0 = inlined_call_operand.vmem [shape: bf16[512,36], index: 0, kind: input, shape index: {}]   ;;  %s1728_s1 = inlined_call_operand.vmem [shape: bf16[36,32], index: 1, kind: input, shape index: {}]   ;;  %s1729_s2 = inlined_call_operand.vmem [shape: f32[1,32], index: 2, kind: input, shape index: {}]   ;;  %s1730_s3 = inlined_call_operand.vmem [shape: f32[2,512], index: 3, kind: input, shape index: {}]   ;;  %s1731_s4 = inlined_call_operand.vmem [shape: f32[32,8], index: 4, kind: input, shape index: {}]   ;;  %s1732_s5 = inlined_call_operand.vmem [shape: f32[1,8], index: 5, kind: input, shape index: {}]   ;;  %s1733_s6 = inlined_call_operand.hbm [shape: f32[2,8], index: 6, kind: output, shape index: {}]  }
   0x1   :  { %v1267_v0 = vld [vmem:[%s1728_s1 + $0x10] ss:$0 sps:$4 sm:$0x33]   ;;  %v1268_v1 = vld [vmem:[%s1728_s1 + $0x8] sm:$0xff]   ;;  %v1270_v3 = vld [vmem:[%s1727_s0] sm:$0xff]  }
   0x2   :  { %1261 = vmatprep.subr.msk.bf16.mxu0 %vm373_vm0, %v1267_v0  ;;  %v375_v2 = vsel %vm373_vm0, %v1267_v0, 0  ;;  %1262 = vmatprep.subr.msk.bf16.mxu1 %vm373_vm0, %v1267_v0  ;;  %v1269_v4 = vld [vmem:[%s1728_s1] sm:$0xff]   ;;  %v1271_v5 = vld [vmem:[%s1727_s0 + $0x8] sm:$0xff]   ;;  %v1272_v6 = vld [vmem:[%s1727_s0 + $0x10] sm:$0xff]  }
   0x3   :  { %1175 = vmatpush3.bf16.msra.mxu0 %v375_v2  ;;  %1258 = vmatpush3.bf16.msra.mxu1 %v375_v2  ;;  %v1273_v7 = vld [vmem:[%s1727_s0 + $0x18] sm:$0xff]   ;;  %v1285_v8 = vld [vmem:[%s1727_s0 + $0xb0] sm:$0xff]   ;;  %v1274_v9 = vld [vmem:[%s1727_s0 + $0x20] sm:$0xff]  }
   0x4   :  { %1176 = vmatprep.subr.bf16.mxu0 %v1268_v1  ;;  %1256 = vmatprep.subr.bf16.mxu1 %v1268_v1  ;;  %v1287_v10 = vld [vmem:[%s1727_s0 + $0xb8] sm:$0xff]   ;;  %v1288_v11 = vld [vmem:[%s1727_s0 + $0xc0] sm:$0xff]   ;;  %v1275_v12 = vld [vmem:[%s1727_s0 + $0x28] sm:$0xff]  }
   0x5   :  { %1180 = vmatprep.mubr.msk.bf16.mxu0 %vm276_vm1, %v1270_v3  ;;  %1224 = vmatprep.mubr.msk.bf16.mxu1 %vm276_vm1, %v1285_v8  ;;  %v1276_v13 = vld [vmem:[%s1727_s0 + $0x30] sm:$0xff]   ;;  %v1289_v14 = vld [vmem:[%s1727_s0 + $0xc8] sm:$0xff]   ;;  %v1277_v16 = vld [vmem:[%s1727_s0 + $0x38] sm:$0xff]  }
   0x6   :  { %v1290_v15 = vld [vmem:[%s1727_s0 + $0xd0] sm:$0xff]   ;;  %v1291_v17 = vld [vmem:[%s1727_s0 + $0xd8] sm:$0xff]   ;;  %v1278_v18 = vld [vmem:[%s1727_s0 + $0x40] sm:$0xff]  }
   0x7   :  { %1177 = vmatpush3.bf16.msra.mxu0 %v1268_v1  ;;  %1259 = vmatpush3.bf16.msra.mxu1 %v1268_v1  ;;  %v1292_v19 = vld [vmem:[%s1727_s0 + $0xe0] sm:$0xff]  }
   0x8   :  { %1178 = vmatprep.subr.bf16.mxu0 %v1269_v4  ;;  %1257 = vmatprep.subr.bf16.mxu1 %v1269_v4 }
   0xb   :  { %1179 = vmatpush3.bf16.msra.mxu0 %v1269_v4  ;;  %1260 = vmatpush3.bf16.msra.mxu1 %v1269_v4 }
   0xe   :  { %1181 = vmatmul.mubr.msk.bf16.vlgmr.msra.gmra.mxu0 %vm276_vm1, %v1271_v5  ;;  %1225 = vmatmul.mubr.msk.bf16.vlgmr.msra.gmra.mxu1 %vm276_vm1, %v1287_v10 }
   0xf   :  { %1184 = vmatprep.mubr.msk.bf16.mxu0 %vm276_vm1, %v1272_v6  ;;  %1228 = vmatprep.mubr.msk.bf16.mxu1 %vm276_vm1, %v1288_v11 }
  0x16   :  { %1185 = vmatmul.mubr.msk.bf16.gmra.mxu0 %vm276_vm1, %v1273_v7  ;;  %1229 = vmatmul.mubr.msk.bf16.gmra.mxu1 %vm276_vm1, %v1289_v14 }
  0x17   :  { %1188 = vmatprep.mubr.msk.bf16.mxu0 %vm276_vm1, %v1274_v9  ;;  %1232 = vmatprep.mubr.msk.bf16.mxu1 %vm276_vm1, %v1290_v15 }
  0x1e   :  { %1189 = vmatmul.mubr.msk.bf16.gmra.mxu0 %vm276_vm1, %v1275_v12 }
  0x1f   :  { %1192 = vmatprep.mubr.msk.bf16.mxu0 %vm276_vm1, %v1276_v13 }
  0x20   :  { %11 = vsyncpa [#allocation3], 0  ;;  %1233 = vmatmul.mubr.msk.bf16.gmra.mxu1 %vm276_vm1, %v1291_v17  ;;  %v1279_v20 = vld [vmem:[%s1727_s0 + $0x48] sm:$0xff]   ;;  %v1280_v22 = vld [vmem:[%s1727_s0 + $0x50] sm:$0xff]   ;;  %v1325_v36 = vmov 1983009808   ;;  %v736_v38 = vlaneseq }
  0x21   :  { %1236 = vmatprep.mubr.msk.bf16.mxu1 %vm276_vm1, %v1292_v19  ;;  %v1294_v21 = vld [vmem:[%s1727_s0 + $0xe8] sm:$0xff]   ;;  %v1296_v23 = vld [vmem:[%s1727_s0 + $0xf0] sm:$0xff]   ;;  %v1281_v24 = vld [vmem:[%s1727_s0 + $0x58] sm:$0xff]   ;;  %v734_v37 = vunpack.c.l.s4 %v1325_v36  ;;  %vm1327_vm2 = vmmov 0   ;;  %vm904_vm3 = vcmask 261120   ;;  %s1328_s27 = smov [#allocation2]  }
  0x22   :  { %v1298_v25 = vld [vmem:[%s1727_s0 + $0xf8] sm:$0xff]   ;;  %v1282_v26 = vld [vmem:[%s1727_s0 + $0x60] sm:$0xff]   ;;  %v1283_v27 = vld [vmem:[%s1727_s0 + $0x68] sm:$0xff]   ;;  %v737_v40 = vshrl.u32 %v736_v38, 7  ;;  %s986_s28 = sshll.u32 %s1328_s27, 4  ;;  %vm978_vm4 = vcmask 58368   ;;  %s987_s28 = int_to_ptr.vmem [resolvable:$true] %s986_s28 }
  0x23   :  { %v1284_v28 = vld [vmem:[%s1727_s0 + $0x70] sm:$0xff]   ;;  %v1286_v29 = vld [vmem:[%s1727_s0 + $0x78] sm:$0xff]   ;;  %v1293_v30 = vld [vmem:[%s1727_s0 + $0x80] sm:$0xff]   ;;  %v735_v39 = vunpack.c.0.s8 %v734_v37  ;;  %p1308_p1 = scmp.lt.s32.totalorder %s987_s28, %s987_s28 }
  0x24   :  { %v1295_v31 = vld [vmem:[%s1727_s0 + $0x88] sm:$0xff]   ;;  %v1297_v32 = vld [vmem:[%s1727_s0 + $0x90] sm:$0xff]   ;;  %v1299_v33 = vld [vmem:[%s1727_s0 + $0x98] sm:$0xff]  }
  0x25   :  { %v1300_v34 = vld [vmem:[%s1727_s0 + $0xa0] sm:$0xff]   ;;  %v1301_v35 = vld [vmem:[%s1727_s0 + $0xa8] sm:$0xff]   ;;  %v738_v41 = vsub.s32 %v735_v39, %v737_v40 }
  0x26   :  { %1193 = vmatmul.mubr.msk.bf16.gmra.mxu0 %vm276_vm1, %v1277_v16  ;;  %v730_v42 = vld [vmem:[%s1730_s3] sm:$0xff] }
  0x27   :  { %1196 = vmatprep.mubr.msk.bf16.mxu0 %vm276_vm1, %v1278_v18  ;;  %v1504_v43 = vrot.slane %v730_v42, %v738_v41  ;;  %v732_v45 = vcombine.high %v730_v42, %v730_v42 }
  0x28   :  { %1237 = vmatmul.mubr.msk.bf16.gmra.mxu1 %vm276_vm1, %v1294_v21 }
  0x29   :  { %1240 = vmatprep.mubr.msk.bf16.mxu1 %vm276_vm1, %v1296_v23  ;;  %v747_v44 = vcombine.high %v1504_v43, %v1504_v43  ;;  %v1508_v46 = vrot.slane %v732_v45, %v738_v41 }
  0x2e   :  { %1197 = vmatmul.mubr.msk.bf16.gmra.mxu0 %vm276_vm1, %v1279_v20 }
  0x2f   :  { %1200 = vmatprep.mubr.msk.bf16.mxu0 %vm276_vm1, %v1280_v22 }
  0x30   :  { %1241 = vmatmul.mubr.msk.bf16.gmra.mxu1 %vm276_vm1, %v1298_v25 }
  0x31   :  { %817 = vmatprep.mubr.f32.mxu1 %v747_v44 }
  0x36   :  { %1201 = vmatmul.mubr.msk.bf16.gmra.mxu0 %vm276_vm1, %v1281_v24  ;;  %v1571_v24 = vld [vmem:[%s1729_s2] ss:$0 sm:$0xff] }
  0x37   :  { %1204 = vmatprep.mubr.msk.bf16.mxu0 %vm276_vm1, %v1282_v26 }
  0x3e   :  { %1205 = vmatmul.mubr.msk.bf16.gmra.mxu0 %vm276_vm1, %v1283_v27 }
  0x3f   :  { %1208 = vmatprep.mubr.msk.bf16.mxu0 %vm276_vm1, %v1284_v28 }
  0x46   :  { %1209 = vmatmul.mubr.msk.bf16.gmra.mxu0 %vm276_vm1, %v1286_v29 }
  0x47   :  { %1212 = vmatprep.mubr.msk.bf16.mxu0 %vm276_vm1, %v1293_v30 }
  0x4e   :  { %1213 = vmatmul.mubr.msk.bf16.gmra.mxu0 %vm276_vm1, %v1295_v31 }
  0x4f   :  { %1216 = vmatprep.mubr.msk.bf16.mxu0 %vm276_vm1, %v1297_v32 }
  0x56   :  { %1217 = vmatmul.mubr.msk.bf16.gmra.mxu0 %vm276_vm1, %v1299_v33 }
  0x57   :  { %1220 = vmatprep.mubr.msk.bf16.mxu0 %vm276_vm1, %v1300_v34 }
  0x5e   :  { %1221 = vmatmul.mubr.msk.bf16.gmra.mxu0 %vm276_vm1, %v1301_v35 }
  0xce   :  { %v1510_v47 = vpop.f32.mrf.mxu0  ;;  %v1528_v56 = vpop.f32.mrf.mxu1 }
  0xd0   :  { %v1512_v48 = vpop.f32.mrf.mxu0  ;;  %v1532_v59 = vpop.f32.mrf.mxu1 }
  0xd2   :  { %v1514_v49 = vpop.f32.mrf.mxu0  ;;  %v1536_v62 = vpop.f32.mrf.mxu1 }
  0xd4   :  { %v1516_v50 = vpop.f32.mrf.mxu0  ;;  %v1538_v1 = vpop.f32.mrf.mxu1 }
  0xd6   :  { %v1518_v51 = vpop.f32.mrf.mxu0  ;;  %v1542_v4 = vpop.f32.mrf.mxu1 }
  0xd8   :  { %v1520_v52 = vpop.f32.mrf.mxu0  ;;  %v1548_v7 = vpop.f32.mrf.mxu1 }
  0xda   :  { %v1522_v53 = vpop.f32.mrf.mxu0  ;;  %v1554_v10 = vpop.f32.mrf.mxu1 }
  0xdc   :  { %v1524_v54 = vpop.f32.mrf.mxu0  ;;  %v1558_v13 = vpop.f32.mrf.mxu1 }
  0xde   :  { %v1526_v55 = vpop.f32.mrf.mxu0 }
  0xe0   :  { %v1530_v57 = vpop.f32.mrf.mxu0  ;;  %v1562_v16 = vpop.f32.mrf.mxu1 }
  0xe2   :  { %v1191_v58 = vpop.f32.mrf.mxu0  ;;  %v1564_v19 = vpop.f32.mrf.mxu1 }
  0xe4   :  { %v1534_v60 = vpop.f32.mrf.mxu0  ;;  %v1566_v22 = vpop.f32.mrf.mxu1 }
  0xe6   :  { %v1194_v61 = vpop.f32.mrf.mxu0  ;;  %v1574_v27 = vpop.f32.mrf.mxu1 }
  0xe7   :  { %v468_v30 = vadd.f32 %v1194_v61, %v1571_v24  ;;  %v455_v61 = vadd.f32 %v1191_v58, %v1571_v24 }
  0xe8   :  { %v459_v63 = vpop.f32.mrf.mxu0  ;;  %v1581_v36 = vpop.f32.mrf.mxu1 }
  0xe9   :  { %v680_v40 = vmax.f32 %v468_v30, 0.0  ;;  %v460_v41 = vadd.f32 %v1571_v24, %v459_v63  ;;  %v452_v63 = vadd.f32 %v1526_v55, %v1571_v24  ;;  %v447_v30 = vadd.f32 %v1571_v24, %v1534_v60 }
  0xea   :  { %v1195_v0 = vpop.f32.mrf.mxu0  ;;  %v439_v60 = vadd.f32 %v1522_v53, %v1571_v24 }
  0xeb   :  { %v471_v25 = vadd.f32 %v1195_v0, %v1571_v24 }
  0xec   :  { %v462_v2 = vpop.f32.mrf.mxu0 }
  0xed   :  { %v681_v34 = vmax.f32 %v471_v25, 0.0  ;;  %v463_v35 = vadd.f32 %v1571_v24, %v462_v2  ;;  %v1591_v2 = vpop.f32.mrf.mxu1 }
  0xee   :  { %v1540_v3 = vpop.f32.mrf.mxu0 }
  0xef   :  { %v679_v0 = vmax.f32 %v463_v35, 0.0 }
  0xf0   :  { %v1544_v5 = vpop.f32.mrf.mxu0 }
  0xf2   :  { %v1546_v6 = vpop.f32.mrf.mxu0 }
  0xf4   :  { %v1550_v8 = vpop.f32.mrf.mxu0 }
  0xf6   :  { %v1552_v9 = vpop.f32.mrf.mxu0 }
  0xf8   :  { %v1556_v11 = vpop.f32.mrf.mxu0 }
  0xfa   :  { %v1203_v12 = vpop.f32.mrf.mxu0 }
  0xfc   :  { %v1560_v14 = vpop.f32.mrf.mxu0 }
  0xfd   :  { %v495_v53 = vadd.f32 %v1571_v24, %v1560_v14  ;;  %v487_v14 = vadd.f32 %v1546_v6, %v1571_v24 }
  0xfe   :  { %v1206_v15 = vpop.f32.mrf.mxu0 }
  0xff   :  { %v685_v6 = vmax.f32 %v487_v14, 0.0 }
 0x100   :  { %v507_v17 = vpop.f32.mrf.mxu0 }
 0x102   :  { %v1207_v18 = vpop.f32.mrf.mxu0 }
 0x103   :  { %v519_v44 = vadd.f32 %v1207_v18, %v1571_v24 }
 0x104   :  { %v510_v20 = vpop.f32.mrf.mxu0 }
 0x105   :  { %v511_v58 = vadd.f32 %v1571_v24, %v510_v20  ;;  %v503_v20 = vadd.f32 %v1203_v12, %v1571_v24 }
 0x106   :  { %v1210_v21 = vpop.f32.mrf.mxu0 }
 0x107   :  { %v532_v28 = vadd.f32 %v1210_v21, %v1571_v24  ;;  %v691_v35 = vmax.f32 %v511_v58, 0.0 }
 0x108   :  { %v523_v23 = vpop.f32.mrf.mxu0 }
 0x109   :  { %v696_v38 = vmax.f32 %v532_v28, 0.0  ;;  %v524_v39 = vadd.f32 %v1571_v24, %v523_v23  ;;  %v516_v23 = vadd.f32 %v1206_v15, %v1571_v24  ;;  %v693_v28 = vmax.f32 %v519_v44, 0.0 }
 0x10a   :  { %v1211_v26 = vpop.f32.mrf.mxu0  ;;  %v689_v44 = vmax.f32 %v503_v20, 0.0  ;;  %v476_v20 = vadd.f32 %v1571_v24, %v1544_v5 }
 0x10b   :  { %v535_v29 = vadd.f32 %v1211_v26, %v1571_v24  ;;  %v694_v25 = vmax.f32 %v524_v39, 0.0  ;;  %v678_v26 = vmax.f32 %v460_v41, 0.0  ;;  %v692_v15 = vmax.f32 %v516_v23, 0.0 }
 0x10c   :  { %v526_v31 = vpop.f32.mrf.mxu0  ;;  %v492_v23 = vadd.f32 %v1571_v24, %v1556_v11  ;;  %v484_v11 = vadd.f32 %v1540_v3, %v1571_v24 }
 0x10d   :  { %v697_v32 = vmax.f32 %v535_v29, 0.0  ;;  %v527_v33 = vadd.f32 %v1571_v24, %v526_v31  ;;  %v677_v29 = vmax.f32 %v455_v61, 0.0  ;;  %v1603_v31 = vpop.f32.mrf.mxu1  ;;  %v431_v61 = vadd.f32 %v1571_v24, %v1524_v54 }
 0x10e   :  { %v1583_v37 = vpop.f32.mrf.mxu0  ;;  %v423_v54 = vadd.f32 %v1514_v49, %v1571_v24  ;;  %v647_v14 = vadd.f32 %v1603_v31, %v1571_v24 }
 0x10f   :  { %1099 = vmatprep.subr.mxu1 %v697_v32  ;;  %v695_v45 = vmax.f32 %v527_v33, 0.0  ;;  %v508_v32 = vadd.f32 %v1571_v24, %v507_v17  ;;  %v676_v33 = vmax.f32 %v452_v63, 0.0  ;;  %v1613_v39 = vpop.f32.mrf.mxu1  ;;  %v500_v17 = vadd.f32 %v1552_v9, %v1571_v24 }
 0x110   :  { %1100 = vmatpush3.msra.mxu1 %v681_v34  ;;  %v1587_v42 = vpop.f32.mrf.mxu0  ;;  %v444_v34 = vadd.f32 %v1571_v24, %v1530_v57  ;;  %v436_v57 = vadd.f32 %v1518_v51, %v1571_v24  ;;  %v428_v63 = vadd.f32 %v1571_v24, %v1520_v52  ;;  %v420_v52 = vadd.f32 %v1510_v47, %v1571_v24 }
 0x111   :  { %1101 = vmatprep.subr.mxu1 %v696_v38  ;;  %v675_v38 = vmax.f32 %v447_v30, 0.0  ;;  %v1242_v9 = vpop.f32.mrf.mxu1  ;;  %v669_v49 = vmax.f32 %v423_v54, 0.0  ;;  %v639_v31 = vadd.f32 %v1571_v24, %v1613_v39 }
 0x112   :  { %1102 = vmatpush3.msra.mxu1 %v680_v40  ;;  %v1593_v21 = vpop.f32.mrf.mxu0  ;;  %v690_v40 = vmax.f32 %v508_v32, 0.0  ;;  %v674_v12 = vmax.f32 %v444_v34, 0.0  ;;  %v672_v51 = vmax.f32 %v436_v57, 0.0  ;;  %v479_v32 = vadd.f32 %v1571_v24, %v1550_v8 }
 0x113   :  { %1103 = vmatprep.subr.mxu1 %v695_v45  ;;  %v673_v45 = vmax.f32 %v439_v60, 0.0  ;;  %v651_v58 = vpop.f32.mrf.mxu1  ;;  %v684_v34 = vmax.f32 %v484_v11, 0.0  ;;  %v668_v47 = vmax.f32 %v420_v52, 0.0  ;;  %v412_v60 = vadd.f32 %v1571_v24, %v1512_v48 }
 0x114   :  { %1104 = vmatpush3.msra.mxu1 %v679_v0  ;;  %v1598_v18 = vpop.f32.mrf.mxu0  ;;  %v688_v0 = vmax.f32 %v500_v17, 0.0  ;;  %v682_v57 = vmax.f32 %v476_v20, 0.0  ;;  %v660_v5 = vadd.f32 %v1242_v9, %v1571_v24  ;;  %v596_v48 = vadd.f32 %v1528_v56, %v1571_v24 }
 0x115   :  { %1105 = vmatprep.subr.mxu1 %v694_v25  ;;  %v1243_v3 = vpop.f32.mrf.mxu1  ;;  %v628_v20 = vadd.f32 %v1562_v16, %v1571_v24  ;;  %v620_v16 = vadd.f32 %v1571_v24, %v1564_v19 }
 0x116   :  { %1106 = vmatpush3.msra.mxu1 %v678_v26  ;;  %v1606_v55 = vpop.f32.mrf.mxu0  ;;  %v687_v26 = vmax.f32 %v495_v53, 0.0  ;;  %v663_v8 = vadd.f32 %v1243_v3, %v1571_v24  ;;  %v748_v53 = vcombine.high %v1508_v46, %v1508_v46  ;;  %v728_v9 = vmax.f32 %v660_v5, 0.0 }
 0x117   :  { %1107 = vmatprep.subr.mxu1 %v693_v28  ;;  %v671_v28 = vmax.f32 %v431_v61, 0.0  ;;  %v723_v3 = vmax.f32 %v639_v31, 0.0  ;;  %v718_v19 = vmax.f32 %v620_v16, 0.0  ;;  %v548_v5 = vadd.f32 %v1583_v37, %v1571_v24 }
 0x118   :  { %1108 = vmatpush3.msra.mxu1 %v677_v29  ;;  %v1617_v41 = vpop.f32.mrf.mxu0  ;;  %v686_v29 = vmax.f32 %v492_v23, 0.0  ;;  %v652_v23 = vadd.f32 %v1571_v24, %v651_v58  ;;  %v540_v37 = vadd.f32 %v1571_v24, %v1587_v42  ;;  %v894_v42 = vld [vmem:[%s1731_s4 + $0x8] sm:$0xff] }
 0x119   :  { %1109 = vmatprep.subr.mxu1 %v692_v15  ;;  %v670_v15 = vmax.f32 %v428_v63, 0.0  ;;  %v588_v63 = vadd.f32 %v1571_v24, %v1532_v59 }
 0x11a   :  { %1110 = vmatpush3.msra.mxu1 %v676_v33  ;;  %v1627_v25 = vpop.f32.mrf.mxu0  ;;  %v415_v33 = vadd.f32 %v1571_v24, %v1516_v50  ;;  %v599_v50 = vadd.f32 %v1536_v62, %v1571_v24 }
 0x11b   :  { %1111 = vmatprep.subr.mxu1 %v691_v35  ;;  %v710_v11 = vmax.f32 %v588_v63, 0.0  ;;  %v567_v39 = vadd.f32 %v1627_v25, %v1571_v24 }
 0x11c   :  { %1112 = vmatpush3.msra.mxu1 %v675_v38  ;;  %v1637_v30 = vpop.f32.mrf.mxu0  ;;  %v683_v38 = vmax.f32 %v479_v32, 0.0  ;;  %v667_v17 = vmax.f32 %v415_v33, 0.0  ;;  %v713_v62 = vmax.f32 %v599_v50, 0.0  ;;  %v631_v33 = vadd.f32 %v1566_v22, %v1571_v24 }
 0x11d   :  { %1113 = vmatprep.subr.mxu1 %v690_v40  ;;  %v654_v40 = vpop.f32.mrf.mxu1  ;;  %v623_v22 = vadd.f32 %v1571_v24, %v1574_v27  ;;  %v559_v25 = vadd.f32 %v1571_v24, %v1637_v30  ;;  %v615_v50 = vadd.f32 %v1554_v10, %v1571_v24  ;;  %v607_v10 = vadd.f32 %v1571_v24, %v1558_v13 }
 0x11e   :  { %1114 = vmatpush3.msra.mxu1 %v674_v12  ;;  %v1222_v35 = vpop.f32.mrf.mxu0  ;;  %v655_v61 = vadd.f32 %v1571_v24, %v654_v40  ;;  %v551_v40 = vadd.f32 %v1593_v21, %v1571_v24  ;;  %v543_v21 = vadd.f32 %v1571_v24, %v1598_v18  ;;  %v1326_v18 = vmov 0.0  }
 0x11f   :  { %1115 = vmatprep.subr.mxu1 %v689_v44  ;;  %v666_v44 = vmax.f32 %v412_v60, 0.0  ;;  %v580_v59 = vadd.f32 %v1222_v35, %v1571_v24  ;;  %v721_v60 = vmax.f32 %v631_v33, 0.0  ;;  %v719_v27 = vmax.f32 %v623_v22, 0.0 }
 0x120   :  { %1116 = vmatpush3.msra.mxu1 %v673_v45  ;;  %v571_v12 = vpop.f32.mrf.mxu0  ;;  %v729_v45 = vmax.f32 %v663_v8, 0.0  ;;  %v720_v8 = vmax.f32 %v628_v20, 0.0  ;;  %v703_v30 = vmax.f32 %v559_v25, 0.0 }
 0x121   :  { %1117 = vmatprep.subr.mxu1 %v688_v0  ;;  %v591_v0 = vadd.f32 %v1571_v24, %v1538_v1  ;;  %v708_v32 = vmax.f32 %v580_v59, 0.0 }
 0x122   :  { %1118 = vmatpush3.msra.mxu1 %v672_v51  ;;  %v1223_v56 = vpop.f32.mrf.mxu0  ;;  %v712_v51 = vmax.f32 %v596_v48, 0.0 }
 0x123   :  { %1119 = vmatprep.subr.mxu1 %v687_v26  ;;  %v727_v26 = vmax.f32 %v655_v61, 0.0  ;;  %v711_v1 = vmax.f32 %v591_v0, 0.0  ;;  %v583_v54 = vadd.f32 %v1223_v56, %v1571_v24  ;;  %v699_v61 = vmax.f32 %v543_v21, 0.0 }
 0x124   :  { %1120 = vmatpush3.msra.mxu1 %v671_v28  ;;  %v644_v28 = vadd.f32 %v1581_v36, %v1571_v24  ;;  %v574_v58 = vpop.f32.mrf.mxu0  ;;  %v636_v36 = vadd.f32 %v1571_v24, %v1591_v2  ;;  %v564_v2 = vadd.f32 %v1606_v55, %v1571_v24  ;;  %v556_v55 = vadd.f32 %v1571_v24, %v1617_v41 }
 0x125   :  { %1121 = vmatprep.subr.mxu1 %v686_v29  ;;  %v725_v29 = vmax.f32 %v647_v14, 0.0  ;;  %v709_v52 = vmax.f32 %v583_v54, 0.0 }
 0x126   :  { %1122 = vmatpush3.msra.mxu1 %v670_v15  ;;  %v575_v15 = vadd.f32 %v1571_v24, %v574_v58  ;;  %v722_v35 = vmax.f32 %v636_v36, 0.0  ;;  %v702_v41 = vmax.f32 %v556_v55, 0.0 }
 0x127   :  { %1123 = vmatprep.subr.mxu1 %v685_v6  ;;  %v724_v6 = vmax.f32 %v644_v28, 0.0 }
 0x128   :  { %1124 = vmatpush3.msra.mxu1 %v669_v49  ;;  %v572_v49 = vadd.f32 %v1571_v24, %v571_v12  ;;  %v717_v12 = vmax.f32 %v615_v50, 0.0 }
 0x129   :  { %1125 = vmatprep.subr.mxu1 %v684_v34  ;;  %v707_v34 = vmax.f32 %v575_v15, 0.0 }
 0x12a   :  { %1126 = vmatpush3.msra.mxu1 %v668_v47  ;;  %v706_v47 = vmax.f32 %v572_v49, 0.0 }
 0x12b   :  { %1127 = vmatprep.subr.mxu1 %v683_v38  ;;  %v705_v38 = vmax.f32 %v567_v39, 0.0 }
 0x12c   :  { %1128 = vmatpush3.msra.mxu1 %v667_v17  ;;  %v704_v17 = vmax.f32 %v564_v2, 0.0 }
 0x12d   :  { %1129 = vmatprep.subr.mxu1 %v682_v57  ;;  %v612_v57 = vadd.f32 %v1542_v4, %v1571_v24  ;;  %v604_v4 = vadd.f32 %v1571_v24, %v1548_v7  ;;  %v896_v7 = vld [vmem:[%s1731_s4 + $0x18] sm:$0xff]  ;;  %v895_v24 = vld [vmem:[%s1731_s4 + $0x10] sm:$0xff] }
 0x12e   :  { %1130 = vmatpush3.msra.mxu1 %v666_v44  ;;  %v701_v44 = vmax.f32 %v551_v40, 0.0 }
 0x12f   :  { %1134 = vmatprep.subr.mxu1 %v729_v45  ;;  %818 = vmatmul.mubr.f32.vlgmr.msra.gmra.mxu1 %v1504_v43  ;;  %v726_v43 = vmax.f32 %v652_v23, 0.0  ;;  %v716_v48 = vmax.f32 %v612_v57, 0.0  ;;  %v715_v45 = vmax.f32 %v607_v10, 0.0  ;;  %v714_v13 = vmax.f32 %v604_v4, 0.0 }
 0x130   :  { %1135 = vmatpush3.msra.mxu1 %v713_v62  ;;  %887 = vmatprep.mubr.f32.mxu1 %v748_v53  ;;  %v700_v53 = vmax.f32 %v548_v5, 0.0  ;;  %v698_v62 = vmax.f32 %v540_v37, 0.0 }
 0x131   :  { %1136 = vmatprep.subr.mxu1 %v728_v9 }
 0x132   :  { %1137 = vmatpush3.msra.mxu1 %v712_v51 }
 0x133   :  { %1138 = vmatprep.subr.mxu1 %v727_v26  ;;  %v1062_v26 = vld [vmem:[%s1732_s5] ss:$0 sm:$0xff] }
 0x134   :  { %1139 = vmatpush3.msra.mxu1 %v711_v1 }
 0x135   :  { %1140 = vmatprep.subr.mxu1 %v726_v43 }
 0x136   :  { %1141 = vmatpush3.msra.mxu1 %v710_v11 }
 0x137   :  { %1142 = vmatprep.subr.mxu1 %v725_v29 }
 0x138   :  { %1143 = vmatpush3.msra.mxu1 %v709_v52 }
 0x139   :  { %1144 = vmatprep.subr.mxu1 %v724_v6 }
 0x13a   :  { %1145 = vmatpush3.msra.mxu1 %v708_v32 }
 0x13b   :  { %1146 = vmatprep.subr.mxu1 %v723_v3 }
 0x13c   :  { %1147 = vmatpush3.msra.mxu1 %v707_v34 }
 0x13d   :  { %1148 = vmatprep.subr.mxu1 %v722_v35 }
 0x13e   :  { %1149 = vmatpush3.msra.mxu1 %v706_v47 }
 0x13f   :  { %1150 = vmatprep.subr.mxu1 %v721_v60 }
 0x140   :  { %1151 = vmatpush3.msra.mxu1 %v705_v38 }
 0x141   :  { %1152 = vmatprep.subr.mxu1 %v720_v8 }
 0x142   :  { %1153 = vmatpush3.msra.mxu1 %v704_v17 }
 0x143   :  { %1154 = vmatprep.subr.mxu1 %v719_v27 }
 0x144   :  { %1155 = vmatpush3.msra.mxu1 %v703_v30 }
 0x145   :  { %1156 = vmatprep.subr.mxu1 %v718_v19 }
 0x146   :  { %1157 = vmatpush3.msra.mxu1 %v702_v41 }
 0x147   :  { %1158 = vmatprep.subr.mxu1 %v717_v12 }
 0x148   :  { %1159 = vmatpush3.msra.mxu1 %v701_v44 }
 0x149   :  { %1160 = vmatprep.subr.mxu1 %v716_v48 }
 0x14a   :  { %1161 = vmatpush3.msra.mxu1 %v700_v53 }
 0x14b   :  { %1162 = vmatprep.subr.mxu1 %v715_v45 }
 0x14c   :  { %1163 = vmatpush3.msra.mxu1 %v699_v61 }
 0x14d   :  { %1164 = vmatprep.subr.mxu1 %v714_v13 }
 0x14e   :  { %1165 = vmatpush3.msra.mxu1 %v698_v62 }
 0x14f   :  { %888 = vmatmul.mubr.f32.vlgmr.msra.gmra.mxu1 %v1508_v46  ;;  %1244 = vmatprep.subr.mxu1 %v1326_v18  ;;  %v893_v46 = vld [vmem:[%s1731_s4] sm:$0xff]  ;;  %s1303_s4 = scalar_lea.vmem %s987_s28, 32 }
 0x150   :  { %1245 = vmatpush3.msra.mxu1 %v896_v7  ;;  %1252 = vmatprep.mubr.msk.f32.mxu1 %vm1327_vm2, %v1326_v18  ;;  %p1304_p0 = scmp.ne.s32.totalorder %s987_s28, %s1303_s4  ;;  %p1309_p2 = scmp.lt.s32.totalorder %s1303_s4, %s1303_s4 }
 0x151   :  { %1246 = vmatprep.subr.mxu1 %v1326_v18 }
 0x152   :  { %1247 = vmatpush3.msra.mxu1 %v895_v24  ;;  %p1310_p3 = por %p1309_p2, %p1308_p1 }
 0x153   :  { %1248 = vmatprep.subr.mxu1 %v1326_v18 }
 0x154   :  { %1249 = vmatpush3.msra.mxu1 %v894_v42  ;;  %p1311_p4 = pnand %p1310_p3, %p1304_p0 }
 0x155   :  { %1250 = vmatprep.subr.mxu1 %v1326_v18 }
 0x156   :  { %1251 = vmatpush3.msra.mxu1 %v893_v46 }
 0x1ef   :  { %v1131_v0 = vpop.f32.mrf.mxu1 }
 0x1f1   :  { %v1132_v9 = vpop.f32.mrf.mxu1 }
 0x1f2   :  { %v1133_v51 = vadd.f32 %v1132_v9, %v1131_v0 }
 0x20f   :  { %v1166_v23 = vpop.f32.mrf.mxu1 }
 0x211   :  { %v1167_v56 = vpop.f32.mrf.mxu1 }
 0x212   :  { %v1168_v63 = vadd.f32 %v1167_v56, %v1166_v23 }
 0x214   :  { %v890_v14 = vadd.f32 %v1168_v63, %v1133_v51 }
 0x216   :  { %1253 = vmatmul.mubr.msk.f32.vlgmr.msra.gmra.mxu1 %vm904_vm3, %v890_v14 }
 0x2d6   :  { %v974_v1 = vpop.f32.mrf.mxu1 }
 0x2d7   :  { %v975_v54 = vadd.f32 %v1062_v26, %v974_v1 }
 0x2d8   :  { %v1254_v28 = vpop.f32.mrf.mxu1 }
 0x2d9   :  { %979 = vst.msk [vmem:[#allocation2] sm:$0x3] %vm978_vm4, %v975_v54 }
 0x2da   :  { %1314 = shalt.err (!%p1311_p4)
}
 0x2db   :  { %989 = dma.vmem_to_hbm [thread:$0]  %s987_s28, 32, %s1733_s6, [#allocation3]  }
 0x2dc   :  { %1323 = dma.done.wait [#allocation3], 32  }
 0x2dd   :  { %1324 = vsyncadd [#allocation3], 4294967264 }
 0x2de   :  { %993 = vsyncpa [#allocation3], 1 }

</bundles_post_ra>
